<compile_context>
chip_gen: v7x
topology: tpu7x:2x2x1
jax: 0.10.0
libtpu: 0.0.40
codegen_flags: <defaults>
</compile_context>

<pallas_src>
import math

import jax
import jax.numpy as jnp
from jax.experimental import pallas as pl
from jax.experimental.pallas import tpu as pltpu


def _round_up(v, m):
    return ((v + m - 1) // m) * m


def attention_kernel(x_ref, w1t_ref, b1_ref, w2_ref, b2_ref, o_ref):
    # x_ref:  (tm, D)  native dtype tile of rows (cast to bf16 in-kernel)
    # w1t_ref:(D, D)   bf16, attn_1.weight.T  (so we compute x @ W1^T)
    # b1_ref: (1, D)   f32
    # w2_ref: (1, D)   f32, attn_2.weight as a row vector
    # b2_ref: (1,)     f32 scalar in SMEM
    # o_ref:  (1, tm)  lane-dense output slab in the final dtype
    x = x_ref[...]
    if x.dtype != w1t_ref.dtype:
        x = x.astype(w1t_ref.dtype)          # in-kernel cast: no extra HBM pass
    h = jnp.dot(x, w1t_ref[...], preferred_element_type=jnp.float32)
    h = jnp.tanh(h + b1_ref[...])            # f32 epilogue (EUP/VPU; free under MXU/DMA)
    # attn_2 is a D->1 linear: elementwise mul + lane reduction (f32 on VPU/XLU).
    scores = jnp.sum(h * w2_ref[...], axis=-1) + b2_ref[0]        # (tm,)
    o_ref[...] = scores[None, :].astype(o_ref.dtype)              # lane-dense store


def attention_forward(x, w1, b1, w2, b2, *, tm=None, compute_dtype=jnp.bfloat16):
    """x: (B, S, D). w1: (D, D) torch layout (out, in). b1: (D,). w2: (1, D). b2: (1,).

    Returns (B, S, 1) in x.dtype."""
    B, S, D = x.shape
    M = B * S
    out_dtype = x.dtype
    x_itemsize = jnp.dtype(x.dtype).itemsize
    csize = jnp.dtype(compute_dtype).itemsize

    # ---- row-tile selection ------------------------------------------------
    M128 = _round_up(M, 128)
    if tm is None:
        # Size the x DMA buffer to ~2 MiB (per-grid-step overhead ~0.35us, so
        # tiny tiles are overhead-bound), but keep at least 512 rows of MXU M.
        tm = max(512, (2 * 1024 * 1024) // (D * x_itemsize))
    tm = max(128, (int(tm) // 128) * 128)
    tm = min(tm, M128)
    # v7x has 2 TensorCores: prefer >= 2 grid steps on the "parallel" row axis
    # so the cores can split the work (no-op on single-TC v5e/v6e).
    if M128 >= 256 and pl.cdiv(M, tm) < 2:
        tm = min(tm, max(128, _round_up((M + 1) // 2, 128)))

    grid = pl.cdiv(M, tm)
    M_out = grid * tm

    # ---- operands ------------------------------------------------------------
    x2d = x.reshape(M, D)                      # free reshape, native dtype (no pre-cast)
    if M < tm:
        # Only for tiny inputs (less than one tile of rows): top up so the single
        # block never extends past the array.  For M >= tm the ragged last tile
        # is handled by Pallas directly (no full-size pad pass).
        x2d = jnp.pad(x2d, ((0, tm - M), (0, 0)))

    w1t = jnp.asarray(w1).T.astype(compute_dtype)                 # (D, D), one-time tiny cast
    b1r = jnp.asarray(b1).reshape(1, D).astype(jnp.float32)
    w2r = jnp.asarray(w2).reshape(1, D).astype(jnp.float32)
    b2s = jnp.asarray(b2).reshape(1).astype(jnp.float32)

    # ---- VMEM budget ---------------------------------------------------------
    # Only raise the scoped VMEM limit when the resident W1^T + double-buffered
    # x tiles + the f32 h intermediate actually need it; cap below the physical
    # VMEM of the current chip (v7x has only 64 MiB per TensorCore).
    vmem_est = (2 * tm * D * x_itemsize        # double-buffered x tiles (native dtype)
                + 2 * D * D * csize            # resident W1^T (conservatively x2)
                + 2 * tm * D * 4               # f32 h / tanh intermediates
                + 4 * D * 4                    # b1, w2
                + 2 * tm * (jnp.dtype(out_dtype).itemsize + 4))   # output slabs
    compiler_kwargs = dict(dimension_semantics=("parallel",))
    if vmem_est > 12 * 1024 * 1024:
        try:
            vmem_cap = int(pltpu.get_tpu_info().vmem_capacity_bytes * 0.85)
        except Exception:
            vmem_cap = 48 * 1024 * 1024        # safe headroom even on v7x (64 MiB)
        compiler_kwargs["vmem_limit_bytes"] = int(min(2 * vmem_est, vmem_cap))

    out = pl.pallas_call(
        attention_kernel,
        out_shape=jax.ShapeDtypeStruct((1, M_out), out_dtype),
        grid_spec=pltpu.PrefetchScalarGridSpec(
            num_scalar_prefetch=0,
            grid=(grid,),
            in_specs=[
                pl.BlockSpec((tm, D), lambda i: (i, 0)),            # x row tile (native dtype)
                pl.BlockSpec((D, D), lambda i: (0, 0)),             # W1^T (resident, bf16)
                pl.BlockSpec((1, D), lambda i: (0, 0)),             # b1
                pl.BlockSpec((1, D), lambda i: (0, 0)),             # w2
                pl.BlockSpec(memory_space=pltpu.MemorySpace.SMEM),  # b2 scalar
            ],
            out_specs=pl.BlockSpec((1, tm), lambda i: (0, i)),      # lane-dense slab
        ),
        compiler_params=pltpu.CompilerParams(**compiler_kwargs),
    )(x2d, w1t, b1r, w2r, b2s)

    return out[0, :M].reshape(B, S, 1)


def xavier_uniform(key, shape):
    # torch.nn.init.xavier_uniform_ for a 2D weight (out, in)
    fan_out, fan_in = shape
    bound = math.sqrt(6.0 / (fan_in + fan_out))
    return jax.random.uniform(key, shape, jnp.float32, minval=-bound, maxval=bound)


def _reference_f32(x, w1, b1, w2, b2):
    return jnp.tanh(x @ w1.T + b1) @ w2.T + b2


def _reference_matched(x, w1, b1, w2, b2, compute_dtype=jnp.bfloat16):
    # Same bf16-in / f32-accumulate numerics as the kernel.
    h = jnp.dot(x.astype(compute_dtype), w1.T.astype(compute_dtype),
                preferred_element_type=jnp.float32)
    h = jnp.tanh(h + b1.astype(jnp.float32))
    return h @ w2.T.astype(jnp.float32) + b2.astype(jnp.float32)


def _run_case(key, B, S, D, **kwargs):
    kx, kw1, kw2 = jax.random.split(key, 3)
    x = jax.random.normal(kx, (B, S, D), jnp.float32)
    w1 = xavier_uniform(kw1, (D, D))          # attn_1.weight  (out, in)
    b1 = jnp.zeros((D,), jnp.float32)         # attn_1.bias
    w2 = xavier_uniform(kw2, (1, D))          # attn_2.weight
    b2 = jnp.zeros((1,), jnp.float32)         # attn_2.bias

    out = jax.block_until_ready(attention_forward(x, w1, b1, w2, b2, **kwargs))
    assert out.shape == (B, S, 1)

    ref_matched = _reference_matched(x, w1, b1, w2, b2)
    ref_f32 = _reference_f32(x, w1, b1, w2, b2)
    assert jnp.allclose(out, ref_matched, atol=1e-3, rtol=1e-3)
    assert jnp.allclose(out, ref_f32, atol=5e-2, rtol=5e-2)


if __name__ == "__main__":
    key = jax.random.PRNGKey(0)
    k1, k2, k3 = jax.random.split(key, 3)

    # Small shape matching the module (batch=2, seq=8, feature_dim=32); exercises
    # the tiny-M path (M=16 -> one 128-row tile, input topped up in-wrapper).
    _run_case(k1, B=2, S=8, D=32)

    # Multi-step grid with an explicit small tile (M=384 -> 3 tiles of 128 rows).
    _run_case(k2, B=3, S=128, D=64, tm=128)

    # Auto-tiled path: M=384 -> tm shrinks to 256 for >=2 grid steps (v7x dual-TC),
    # ragged last input tile (rows 256..383 valid, rest sliced off).
    _run_case(k3, B=3, S=128, D=64)

    print("KERNEL_OK")
</pallas_src>

<mosaic_0001>
module attributes {stable_mosaic.version = 11 : i64} {
  func.func @attention_kernel(%arg0: i32, %arg1: memref<128x32xf32, #tpu.memory_space<vmem>>, %arg2: memref<32x32xbf16, #tpu.memory_space<vmem>>, %arg3: memref<1x32xf32, #tpu.memory_space<vmem>>, %arg4: memref<1x32xf32, #tpu.memory_space<vmem>>, %arg5: memref<1xf32, #tpu.memory_space<smem>>, %arg6: memref<1x128xf32, #tpu.memory_space<vmem>>) attributes {dimension_semantics = [#tpu.dimension_semantics<parallel>], iteration_bounds = array<i64: 1>, scalar_prefetch = 0 : i64, scratch_operands = 0 : i64, tpu.core_type = #tpu.core_type<tc>, window_params = [{transform_indices = @transform_0, window_bounds = array<i64: 128, 32>}, {pipeline_mode = #tpu.pipeline_mode<synchronous>, transform_indices = @transform_1, window_bounds = array<i64: 32, 32>}, {pipeline_mode = #tpu.pipeline_mode<synchronous>, transform_indices = @transform_2, window_bounds = array<i64: 1, 32>}, {pipeline_mode = #tpu.pipeline_mode<synchronous>, transform_indices = @transform_3, window_bounds = array<i64: 1, 32>}, {transform_indices = @transform_4, window_bounds = array<i64: 1>}, {transform_indices = @transform_5, window_bounds = array<i64: 1, 128>}]} {
    %c0 = arith.constant 0 : index
    %c0_0 = arith.constant 0 : index
    %0 = vector.load %arg1[%c0, %c0_0] : memref<128x32xf32, #tpu.memory_space<vmem>>, vector<128x32xf32>
    %1 = arith.truncf %0 : vector<128x32xf32> to vector<128x32xbf16>
    %c0_1 = arith.constant 0 : index
    %c0_2 = arith.constant 0 : index
    %2 = vector.load %arg2[%c0_1, %c0_2] : memref<32x32xbf16, #tpu.memory_space<vmem>>, vector<32x32xbf16>
    %cst = arith.constant dense<0.000000e+00> : vector<128x32xf32>
    %3 = tpu.matmul %1, %2, %cst {dimension_numbers = #tpu.dot_dimension_numbers<[1], [0], [0], [1], [0, 0, 1, 1], [], []>} : vector<128x32xbf16>, vector<32x32xbf16>, vector<128x32xf32> -> vector<128x32xf32>
    %c0_3 = arith.constant 0 : index
    %c0_4 = arith.constant 0 : index
    %4 = vector.load %arg3[%c0_3, %c0_4] : memref<1x32xf32, #tpu.memory_space<vmem>>, vector<1x32xf32>
    %5 = vector.broadcast %4 : vector<1x32xf32> to vector<128x32xf32>
    %6 = arith.addf %3, %5 : vector<128x32xf32>
    %7 = math.tanh %6 : vector<128x32xf32>
    %c0_5 = arith.constant 0 : index
    %c0_6 = arith.constant 0 : index
    %8 = vector.load %arg4[%c0_5, %c0_6] : memref<1x32xf32, #tpu.memory_space<vmem>>, vector<1x32xf32>
    %9 = vector.broadcast %8 : vector<1x32xf32> to vector<128x32xf32>
    %10 = arith.mulf %7, %9 : vector<128x32xf32>
    %cst_7 = arith.constant dense<0.000000e+00> : vector<128xf32>
    %11 = vector.multi_reduction <add>, %10, %cst_7 [1] : vector<128x32xf32> to vector<128xf32>
    %c0_8 = arith.constant 0 : index
    %12 = memref.load %arg5[%c0_8] : memref<1xf32, #tpu.memory_space<smem>>
    %13 = vector.broadcast %12 : f32 to vector<128xf32>
    %14 = arith.addf %11, %13 : vector<128xf32>
    %15 = vector.shape_cast %14 : vector<128xf32> to vector<1x128xf32>
    %c0_9 = arith.constant 0 : index
    %c0_10 = arith.constant 0 : index
    %16 = vector.load %arg6[%c0_9, %c0_10] : memref<1x128xf32, #tpu.memory_space<vmem>>, vector<1x128xf32>
    tpu.vector_store %arg6[%c0_9, %c0_10], %15 {strides = array<i32>} : memref<1x128xf32, #tpu.memory_space<vmem>>, vector<1x128xf32>,
    return
  }
  func.func @transform_0(%arg0: i32) -> (i32, i32) {
    %c0_i32 = arith.constant 0 : i32
    %c0_i32_0 = arith.constant 0 : i32
    return %arg0, %c0_i32 : i32, i32
  }
  func.func @transform_1(%arg0: i32) -> (i32, i32) {
    %c0_i32 = arith.constant 0 : i32
    %c0_i32_0 = arith.constant 0 : i32
    %c0_i32_1 = arith.constant 0 : i32
    return %c0_i32, %c0_i32_0 : i32, i32
  }
  func.func @transform_2(%arg0: i32) -> (i32, i32) {
    %c0_i32 = arith.constant 0 : i32
    %c0_i32_0 = arith.constant 0 : i32
    %c0_i32_1 = arith.constant 0 : i32
    return %c0_i32, %c0_i32_0 : i32, i32
  }
  func.func @transform_3(%arg0: i32) -> (i32, i32) {
    %c0_i32 = arith.constant 0 : i32
    %c0_i32_0 = arith.constant 0 : i32
    %c0_i32_1 = arith.constant 0 : i32
    return %c0_i32, %c0_i32_0 : i32, i32
  }
  func.func @transform_4(%arg0: i32) -> i32 {
    %c0_i32 = arith.constant 0 : i32
    %c0_i32_0 = arith.constant 0 : i32
    return %c0_i32 : i32
  }
  func.func @transform_5(%arg0: i32) -> (i32, i32) {
    %c0_i32 = arith.constant 0 : i32
    %c0_i32_0 = arith.constant 0 : i32
    return %c0_i32, %arg0 : i32, i32
  }
}

</mosaic_0001>

<bundles_post_ra>
// kernel: tpu_custom_call.1
= control target key start
LH: loop header
LB: loop body
LE: loop exit
PB: predicated region body
PF: predicated region fallthrough
CT: control target
= control target key end

     0   :  { %vm70_vm0 = vcmask 261120   ;;  %s777_s0 = inlined_call_operand.vmem [shape: f32[128,32], index: 0, kind: input, shape index: {}]   ;;  %s778_s1 = inlined_call_operand.vmem [shape: bf16[32,32], index: 1, kind: input, shape index: {}]   ;;  %s779_s2 = inlined_call_operand.vmem [shape: f32[1,32], index: 2, kind: input, shape index: {}]   ;;  %s780_s3 = inlined_call_operand.vmem [shape: f32[1,32], index: 3, kind: input, shape index: {}]   ;;  %s781_s4 = inlined_call_operand.<no memory space> [shape: f32[1], index: 4, kind: input, shape index: {}]   ;;  %s782_s5 = inlined_call_operand.hbm [shape: f32[1,128], index: 5, kind: output, shape index: {}]  }
   0x1   :  { %v487_v0 = vld [vmem:[%s778_s1] sm:$0xff]   ;;  %v488_v1 = vld [vmem:[%s778_s1 + $0x8] sm:$0xff]   ;;  %v25_v4 = vld [vmem:[%s777_s0 + $0x10] sm:$0xff] }
   0x2   :  { %462 = vmatprep.subr.bf16.mxu0 %v487_v0  ;;  %482 = vmatprep.subr.bf16.mxu1 %v487_v0  ;;  %v23_v2 = vld [vmem:[%s777_s0] sm:$0xff]  ;;  %v24_v3 = vld [vmem:[%s777_s0 + $0x8] sm:$0xff]  ;;  %v26_v6 = vld [vmem:[%s777_s0 + $0x18] sm:$0xff] }
   0x3   :  { %463 = vmatpush3.bf16.msra.mxu0 %v487_v0  ;;  %484 = vmatpush3.bf16.msra.mxu1 %v487_v0  ;;  %v39_v5 = vpack.c.bf16 %v24_v3, %v23_v2  ;;  %v31_v7 = vld [vmem:[%s777_s0 + $0x40] sm:$0xff]  ;;  %v32_v8 = vld [vmem:[%s777_s0 + $0x48] sm:$0xff]  ;;  %v33_v10 = vld [vmem:[%s777_s0 + $0x50] sm:$0xff]  ;;  %v40_v14 = vpack.c.bf16 %v26_v6, %v25_v4 }
   0x4   :  { %464 = vmatprep.subr.bf16.mxu0 %v488_v1  ;;  %483 = vmatprep.subr.bf16.mxu1 %v488_v1  ;;  %v43_v9 = vpack.c.bf16 %v32_v8, %v31_v7  ;;  %v34_v11 = vld [vmem:[%s777_s0 + $0x58] sm:$0xff]  ;;  %v27_v12 = vld [vmem:[%s777_s0 + $0x20] sm:$0xff]  ;;  %v28_v13 = vld [vmem:[%s777_s0 + $0x28] sm:$0xff] }
   0x5   :  { %466 = vmatprep.mubr.msk.bf16.mxu0 %vm70_vm0, %v39_v5  ;;  %v44_v15 = vpack.c.bf16 %v34_v11, %v33_v10  ;;  %v35_v16 = vld [vmem:[%s777_s0 + $0x60] sm:$0xff]  ;;  %v36_v17 = vld [vmem:[%s777_s0 + $0x68] sm:$0xff]  ;;  %v41_v18 = vpack.c.bf16 %v28_v13, %v27_v12 }
   0x6   :  { %474 = vmatprep.mubr.msk.bf16.mxu1 %vm70_vm0, %v43_v9  ;;  %v45_v19 = vpack.c.bf16 %v36_v17, %v35_v16 }
   0x7   :  { %465 = vmatpush3.bf16.msra.mxu0 %v488_v1  ;;  %485 = vmatpush3.bf16.msra.mxu1 %v488_v1 }
   0x8   :  { %11 = vsyncpa [#allocation4], 0  ;;  %v29_v20 = vld [vmem:[%s777_s0 + $0x30] sm:$0xff]  ;;  %v30_v21 = vld [vmem:[%s777_s0 + $0x38] sm:$0xff]  ;;  %vm324_vm1 = vcmask 130112   ;;  %vm331_vm2 = vcmask 195712  }
   0x9   :  { %v37_v22 = vld [vmem:[%s777_s0 + $0x70] sm:$0xff]  ;;  %v38_v23 = vld [vmem:[%s777_s0 + $0x78] sm:$0xff]  ;;  %v42_v24 = vpack.c.bf16 %v30_v21, %v29_v20  ;;  %v641_v26 = vld [vmem:[%s779_s2] ss:$0 sm:$0xff]  ;;  %vm338_vm3 = vcmask 261312   ;;  %vm345_vm4 = vcmask 326912  }
   0xa   :  { %467 = vmatmul.mubr.msk.bf16.vlgmr.msra.gmra.mrb[0].mxu0 %vm70_vm0, %v40_v14  ;;  %475 = vmatmul.mubr.msk.bf16.vlgmr.msra.gmra.mrb[0].mxu1 %vm70_vm0, %v44_v15  ;;  %v46_v25 = vpack.c.bf16 %v38_v23, %v37_v22  ;;  %v654_v50 = vld [vmem:[%s780_s3] ss:$0 sm:$0xff]  ;;  %vm352_vm5 = vcmask 392512   ;;  %vm359_vm6 = vcmask 458112   ;;  %vm366_vm7 = vcmask 523712  }
   0xb   :  { %470 = vmatprep.mubr.msk.bf16.mxu0 %vm70_vm0, %v41_v18  ;;  %478 = vmatprep.mubr.msk.bf16.mxu1 %vm70_vm0, %v45_v19  ;;  %vm373_vm8 = vcmask 589312   ;;  %vm380_vm9 = vcmask 654912   ;;  %vm387_vm10 = vcmask 720512   ;;  %vm394_vm11 = vcmask 786112  }
   0xc   :  { %vm401_vm12 = vcmask 851712   ;;  %vm408_vm13 = vcmask 917312   ;;  %vm415_vm14 = vcmask 982912   ;;  %vm422_vm15 = vcmask 1048512  }
  0x12   :  { %471 = vmatmul.mubr.msk.bf16.gmra.mrb[4].mxu0 %vm70_vm0, %v42_v24  ;;  %479 = vmatmul.mubr.msk.bf16.gmra.mrb[4].mxu1 %vm70_vm0, %v46_v25 }
  0xdd   :  { %v468_v27 = vpop.f32.mrb[0].mxu0  ;;  %v476_v28 = vpop.f32.mrb[0].mxu1 }
  0xde   :  { %v138_v29 = vadd.f32 %v468_v27, %v641_v26  ;;  %v129_v30 = vpop.f32.mrb[1].mxu0  ;;  %v161_v31 = vpop.f32.mrb[1].mxu1  ;;  %v170_v60 = vadd.f32 %v476_v28, %v641_v26 }
  0xdf   :  { %v130_v32 = vadd.f32 %v641_v26, %v129_v30  ;;  %v469_v33 = vpop.f32.mrb[2].mxu0  ;;  %v477_v34 = vpop.f32.mrb[2].mxu1  ;;  %v162_v36 = vadd.f32 %v641_v26, %v161_v31 }
  0xe0   :  { %489 = vtanh.f32 %v138_v29  ;;  %v141_v35 = vadd.f32 %v469_v33, %v641_v26  ;;  %v132_v37 = vpop.f32.mrb[3].mxu0  ;;  %v164_v38 = vpop.f32.mrb[3].mxu1  ;;  %v173_v57 = vadd.f32 %v477_v34, %v641_v26 }
  0xe1   :  { %491 = vtanh.f32 %v130_v32  ;;  %v133_v39 = vadd.f32 %v641_v26, %v132_v37  ;;  %v165_v40 = vadd.f32 %v641_v26, %v164_v38 }
  0xe2   :  { %493 = vtanh.f32 %v141_v35 }
  0xe3   :  { %495 = vtanh.f32 %v162_v36 }
  0xe4   :  { %497 = vtanh.f32 %v133_v39 }
  0xe5   :  { %v472_v41 = vpop.f32.mrb[4].mxu0  ;;  %v480_v42 = vpop.f32.mrb[4].mxu1  ;;  %499 = vtanh.f32 %v165_v40 }
  0xe6   :  { %v154_v43 = vadd.f32 %v472_v41, %v641_v26  ;;  %v145_v44 = vpop.f32.mrb[5].mxu0  ;;  %v177_v45 = vpop.f32.mrb[5].mxu1  ;;  %v186_v14 = vadd.f32 %v480_v42, %v641_v26 }
  0xe7   :  { %v473_v46 = vpop.f32.mrb[6].mxu0  ;;  %v481_v47 = vpop.f32.mrb[6].mxu1  ;;  %v146_v52 = vadd.f32 %v641_v26, %v145_v44  ;;  %v178_v5 = vadd.f32 %v641_v26, %v177_v45  ;;  %v313_v44 = vlaneseq }
  0xe8   :  { %501 = vtanh.f32 %v154_v43  ;;  %v157_v48 = vadd.f32 %v473_v46, %v641_v26  ;;  %v148_v49 = vpop.f32.mrb[7].mxu0  ;;  %v180_v51 = vpop.f32.mrb[7].mxu1  ;;  %v189_v12 = vadd.f32 %v481_v47, %v641_v26 }
  0xe9   :  { %v149_v53 = vadd.f32 %v641_v26, %v148_v49  ;;  %v181_v1 = vadd.f32 %v641_v26, %v180_v51  ;;  %v696_v47 = vand.u32 127, %v313_v44  ;;  %v699_v51 = vshrl.u32 %v313_v44, 7 }
  0xea   :  { %v490_v54 = vpop.eup %489  ;;  %503 = vtanh.f32 %v157_v48 }
  0xeb   :  { %v492_v55 = vpop.eup %491  ;;  %v217_v56 = vmul.f32 %v490_v54, %v654_v50  ;;  %505 = vtanh.f32 %v149_v53  ;;  %v319_v49 = vadd.s32 4294967288, %v696_v47  ;;  %v326_v53 = vadd.s32 4294967280, %v696_v47 }
  0xec   :  { %v215_v58 = vmul.f32 %v492_v55, %v654_v50  ;;  %v494_v59 = vpop.eup %493  ;;  %507 = vtanh.f32 %v146_v52 }
  0xed   :  { %v237_v61 = vsel %vm70_vm0, %v217_v56, 0.0  ;;  %v496_v62 = vpop.eup %495  ;;  %v218_v0 = vmul.f32 %v494_v59, %v654_v50  ;;  %509 = vtanh.f32 %v173_v57  ;;  %v322_v55 = vsub.s32 %v319_v49, %v699_v51 }
  0xee   :  { %238 = vadd.xlane.f32.xlu1 %v237_v61  ;;  %v231_v63 = vsel %vm70_vm0, %v215_v58, 0.0  ;;  %v498_v2 = vpop.eup %497  ;;  %v223_v3 = vmul.f32 %v496_v62, %v654_v50  ;;  %511 = vtanh.f32 %v170_v60  ;;  %v317_v56 = vsub.s32 %v696_v47, %v699_v51 }
  0xef   :  { %232 = vadd.xlane.f32.xlu0 %v231_v63  ;;  %v500_v4 = vpop.eup %499  ;;  %v240_v6 = vsel %vm70_vm0, %v218_v0, 0.0  ;;  %513 = vtanh.f32 %v181_v1  ;;  %v216_v10 = vmul.f32 %v498_v2, %v654_v50  ;;  %v333_v58 = vadd.s32 4294967272, %v696_v47 }
  0xf0   :  { %v255_v7 = vsel %vm70_vm0, %v223_v3, 0.0  ;;  %v224_v9 = vmul.f32 %v500_v4, %v654_v50  ;;  %515 = vtanh.f32 %v178_v5  ;;  %v368_v59 = vadd.s32 4294967232, %v696_v47 }
  0xf1   :  { %v234_v18 = vsel %vm70_vm0, %v216_v10, 0.0  ;;  %517 = vtanh.f32 %v189_v12  ;;  %v714_v61 = vadd.s32 4294967224, %v696_v47  ;;  %v361_v63 = vadd.s32 4294967240, %v696_v47 }
  0xf2   :  { %v502_v8 = vpop.eup %501  ;;  %241 = vadd.xlane.f32.xlu1 %v240_v6  ;;  %v258_v15 = vsel %vm70_vm0, %v224_v9, 0.0  ;;  %519 = vtanh.f32 %v186_v14  ;;  %v329_v0 = vsub.s32 %v326_v53, %v699_v51  ;;  %v354_v1 = vadd.s32 4294967248, %v696_v47 }
  0xf3   :  { %256 = vadd.xlane.f32.xlu0 %v255_v7  ;;  %v221_v13 = vmul.f32 %v502_v8, %v654_v50  ;;  %v347_v2 = vadd.s32 4294967256, %v696_v47  ;;  %v340_v6 = vadd.s32 4294967264, %v696_v47  ;;  %v336_v8 = vsub.s32 %v333_v58, %v699_v51 }
  0xf4   :  { %v504_v11 = vpop.eup %503  ;;  %v371_v9 = vsub.s32 %v368_v59, %v699_v51  ;;  %v364_v12 = vsub.s32 %v361_v63, %v699_v51  ;;  %v410_v53 = vadd.s32 4294967184, %v696_v47  ;;  %v417_v58 = vadd.s32 4294967176, %v696_v47 }
  0xf5   :  { %v222_v16 = vmul.f32 %v504_v11, %v654_v50  ;;  %v506_v17 = vpop.eup %505  ;;  %v249_v21 = vsel %vm70_vm0, %v221_v13, 0.0  ;;  %v378_v11 = vsub.s32 %v714_v61, %v699_v51  ;;  %v389_v13 = vadd.s32 4294967208, %v696_v47 }
  0xf6   :  { %259 = vadd.xlane.f32.xlu1 %v258_v15  ;;  %v508_v19 = vpop.eup %507  ;;  %v220_v22 = vmul.f32 %v506_v17, %v654_v50  ;;  %v350_v17 = vsub.s32 %v347_v2, %v699_v51 }
  0xf7   :  { %235 = vadd.xlane.f32.xlu0 %v234_v18  ;;  %v252_v20 = vsel %vm70_vm0, %v222_v16, 0.0  ;;  %v510_v23 = vpop.eup %509  ;;  %v219_v24 = vmul.f32 %v508_v19, %v654_v50  ;;  %v357_v16 = vsub.s32 %v354_v1, %v699_v51 }
  0xf8   :  { %v512_v25 = vpop.eup %511  ;;  %v246_v27 = vsel %vm70_vm0, %v220_v22, 0.0  ;;  %v226_v28 = vmul.f32 %v510_v23, %v654_v50 }
  0xf9   :  { %v514_v26 = vpop.eup %513  ;;  %v243_v29 = vsel %vm70_vm0, %v219_v24, 0.0  ;;  %v225_v30 = vmul.f32 %v512_v25, %v654_v50 }
  0xfa   :  { %253 = vadd.xlane.f32.xlu1 %v252_v20  ;;  %v516_v31 = vpop.eup %515  ;;  %v228_v32 = vmul.f32 %v514_v26, %v654_v50  ;;  %v264_v33 = vsel %vm70_vm0, %v226_v28, 0.0  ;;  %v343_v20 = vsub.s32 %v340_v6, %v699_v51 }
  0xfb   :  { %250 = vadd.xlane.f32.xlu0 %v249_v21  ;;  %v518_v34 = vpop.eup %517  ;;  %v261_v35 = vsel %vm70_vm0, %v225_v30, 0.0  ;;  %v227_v36 = vmul.f32 %v516_v31, %v654_v50  ;;  %v382_v21 = vadd.s32 4294967216, %v696_v47 }
  0xfc   :  { %v520_v37 = vpop.eup %519  ;;  %v270_v38 = vsel %vm70_vm0, %v228_v32, 0.0  ;;  %v230_v39 = vmul.f32 %v518_v34, %v654_v50  ;;  %v396_v34 = vadd.s32 4294967200, %v696_v47 }
  0xfd   :  { %v267_v40 = vsel %vm70_vm0, %v227_v36, 0.0  ;;  %v229_v41 = vmul.f32 %v520_v37, %v654_v50  ;;  %v704_v50 = vstv %s781_s4  ;;  %s545_s4 = smov [#allocation3]  }
  0xfe   :  { %247 = vadd.xlane.f32.xlu1 %v246_v27  ;;  %v276_v42 = vsel %vm70_vm0, %v230_v39, 0.0  ;;  %v392_v27 = vsub.s32 %v389_v13, %v699_v51  ;;  %v403_v39 = vadd.s32 4294967192, %v696_v47  ;;  %v420_v47 = vsub.s32 %v417_v58, %v699_v51  ;;  %s432_s30 = sshll.u32 %s545_s4, 4  ;;  %s433_s30 = int_to_ptr.vmem [resolvable:$true] %s432_s30 }
  0xff   :  { %244 = vadd.xlane.f32.xlu0 %v243_v29  ;;  %v273_v43 = vsel %vm70_vm0, %v229_v41, 0.0  ;;  %s521_s6 = scalar_lea.vmem %s433_s30, 16  ;;  %s525_s7 = scalar_lea.vmem %s433_s30, 32 }
 0x100   :  { %p522_p0 = scmp.ne.s32.totalorder %s433_s30, %s521_s6  ;;  %p526_p1 = scmp.lt.s32.totalorder %s433_s30, %s433_s30 }
 0x101   :  { %p527_p2 = scmp.lt.s32.totalorder %s525_s7, %s521_s6 }
 0x102   :  { %265 = vadd.xlane.f32.xlu1 %v264_v33  ;;  %v385_v33 = vsub.s32 %v382_v21, %v699_v51 }
 0x103   :  { %262 = vadd.xlane.f32.xlu0 %v261_v35  ;;  %p528_p3 = por %p527_p2, %p526_p1 }
 0x105   :  { %p529_p4 = pnand %p528_p3, %p522_p0 }
 0x106   :  { %271 = vadd.xlane.f32.xlu1 %v270_v38 }
 0x107   :  { %268 = vadd.xlane.f32.xlu0 %v267_v40 }
 0x10a   :  { %277 = vadd.xlane.f32.xlu1 %v276_v42 }
 0x10b   :  { %274 = vadd.xlane.f32.xlu0 %v273_v43 }
 0x17b   :  { %v239_v45 = vpop.xlane.xlu1 %238 }
 0x17c   :  { %v233_v46 = vpop.xlane.xlu0 %232  ;;  %v283_v3 = vadd.f32 %v704_v50, %v239_v45 }
 0x17d   :  { %v281_v57 = vadd.f32 %v704_v50, %v233_v46 }
 0x17e   :  { %v330_v18 = vrot.slane %v283_v3, %v329_v0 }
 0x17f   :  { %v242_v48 = vpop.xlane.xlu1 %241  ;;  %v318_v7 = vrot.slane %v281_v57, %v317_v56  ;;  %v406_v56 = vsub.s32 %v403_v39, %v699_v51 }
 0x180   :  { %v257_v52 = vpop.xlane.xlu0 %256  ;;  %v284_v14 = vadd.f32 %v704_v50, %v242_v48 }
 0x181   :  { %v289_v30 = vadd.f32 %v704_v50, %v257_v52  ;;  %v399_v52 = vsub.s32 %v396_v34, %v699_v51 }
 0x182   :  { %v337_v28 = vrot.slane %v284_v14, %v336_v8 }
 0x183   :  { %v260_v54 = vpop.xlane.xlu1 %259  ;;  %v372_v46 = vrot.slane %v289_v30, %v371_v9 }
 0x184   :  { %v236_v60 = vpop.xlane.xlu0 %235  ;;  %v290_v35 = vadd.f32 %v704_v50, %v260_v54 }
 0x185   :  { %v282_v62 = vadd.f32 %v704_v50, %v236_v60 }
 0x186   :  { %v379_v54 = vrot.slane %v290_v35, %v378_v11 }
 0x187   :  { %v323_v4 = vrot.slane %v282_v62, %v322_v55  ;;  %v254_v5 = vpop.xlane.xlu1 %253 }
 0x188   :  { %v251_v10 = vpop.xlane.xlu0 %250  ;;  %v288_v29 = vadd.f32 %v704_v50, %v254_v5 }
 0x189   :  { %v325_v15 = vsel %vm324_vm1, %v323_v4, %v318_v7  ;;  %v287_v25 = vadd.f32 %v704_v50, %v251_v10  ;;  %v413_v4 = vsub.s32 %v410_v53, %v699_v51 }
 0x18a   :  { %v332_v24 = vsel %vm331_vm2, %v330_v18, %v325_v15  ;;  %v365_v43 = vrot.slane %v288_v29, %v364_v12 }
 0x18b   :  { %v248_v19 = vpop.xlane.xlu1 %247  ;;  %v339_v37 = vsel %vm338_vm3, %v337_v28, %v332_v24  ;;  %v358_v40 = vrot.slane %v287_v25, %v357_v16 }
 0x18c   :  { %v286_v22 = vadd.f32 %v704_v50, %v248_v19  ;;  %v245_v23 = vpop.xlane.xlu0 %244 }
 0x18d   :  { %v285_v26 = vadd.f32 %v704_v50, %v245_v23 }
 0x18e   :  { %v351_v36 = vrot.slane %v286_v22, %v350_v17 }
 0x18f   :  { %v344_v31 = vrot.slane %v285_v26, %v343_v20  ;;  %v266_v32 = vpop.xlane.xlu1 %265 }
 0x190   :  { %v263_v38 = vpop.xlane.xlu0 %262  ;;  %v292_v45 = vadd.f32 %v704_v50, %v266_v32 }
 0x191   :  { %v346_v41 = vsel %vm345_vm4, %v344_v31, %v339_v37  ;;  %v291_v42 = vadd.f32 %v704_v50, %v263_v38 }
 0x192   :  { %v353_v44 = vsel %vm352_vm5, %v351_v36, %v346_v41  ;;  %v393_v62 = vrot.slane %v292_v45, %v392_v27 }
 0x193   :  { %v360_v48 = vsel %vm359_vm6, %v358_v40, %v353_v44  ;;  %v272_v49 = vpop.xlane.xlu1 %271  ;;  %v386_v60 = vrot.slane %v291_v42, %v385_v33 }
 0x194   :  { %v367_v55 = vsel %vm366_vm7, %v365_v43, %v360_v48  ;;  %v269_v57 = vpop.xlane.xlu0 %268  ;;  %v294_v0 = vadd.f32 %v704_v50, %v272_v49 }
 0x195   :  { %v374_v59 = vsel %vm373_vm8, %v372_v46, %v367_v55  ;;  %v293_v61 = vadd.f32 %v704_v50, %v269_v57 }
 0x196   :  { %v381_v63 = vsel %vm380_vm9, %v379_v54, %v374_v59  ;;  %v407_v10 = vrot.slane %v294_v0, %v406_v56 }
 0x197   :  { %v388_v1 = vsel %vm387_vm10, %v386_v60, %v381_v63  ;;  %v400_v2 = vrot.slane %v293_v61, %v399_v52  ;;  %v278_v3 = vpop.xlane.xlu1 %277 }
 0x198   :  { %v395_v5 = vsel %vm394_vm11, %v393_v62, %v388_v1  ;;  %v296_v6 = vadd.f32 %v704_v50, %v278_v3  ;;  %v275_v7 = vpop.xlane.xlu0 %274 }
 0x199   :  { %v402_v8 = vsel %vm401_vm12, %v400_v2, %v395_v5  ;;  %v295_v9 = vadd.f32 %v704_v50, %v275_v7 }
 0x19a   :  { %v421_v12 = vrot.slane %v296_v6, %v420_v47  ;;  %v409_v13 = vsel %vm408_vm13, %v407_v10, %v402_v8 }
 0x19b   :  { %v414_v11 = vrot.slane %v295_v9, %v413_v4 }
 0x19d   :  { %v416_v14 = vsel %vm415_vm14, %v414_v11, %v409_v13 }
 0x19e   :  { %v423_v15 = vsel %vm422_vm15, %v421_v12, %v416_v14 }
 0x19f   :  { %425 = vst [vmem:[#allocation3] sm:$0x1] %v423_v15 }
 0x1a0   :  { %532 = shalt.err (!%p529_p4)
}
 0x1a1   :  { %s533_s10 = scalar_lea.hbm %s782_s5, 16 }
 0x1a2   :  { %p534_p5 = scmp.ne.s32.totalorder %s782_s5, %s533_s10  ;;  %p537_p6 = scmp.lt.u32.totalorder %s533_s10, %s782_s5 }
 0x1a4   :  { %p539_p7 = pnand %p537_p6, %p534_p5 }
 0x1a6   :  { %542 = shalt.err (!%p539_p7)
}
 0x1a7   :  { %435 = dma.vmem_to_hbm [thread:$0]  %s433_s30, 16, %s782_s5, [#allocation4]  }
 0x1a8   :  { %543 = dma.done.wait [#allocation4], 16  }
 0x1a9   :  { %544 = vsyncadd [#allocation4], 4294967280 }
 0x1aa   :  { %439 = vsyncpa [#allocation4], 1 }

</bundles_post_ra>
